<compile_context>
chip_gen: v7x
topology: tpu7x:2x2x1
jax: 0.10.0
libtpu: 0.0.40
codegen_flags: <defaults>
</compile_context>

<pallas_src>
import math

import jax
import jax.numpy as jnp
from jax.experimental import pallas as pl
from jax.experimental.pallas import tpu as pltpu

_LANE = 128
_SUBLANE = 8


def _round_up(n, m):
    return ((n + m - 1) // m) * m


def _mlp_kernel(x_ref, w1_ref, b1_ref, w2_ref, b2_ref, out_ref):
    # fc1 on the MXU in f32 (kernel is HBM-bound; MXU has enormous slack).
    h = jnp.dot(x_ref[...], w1_ref[...], preferred_element_type=jnp.float32)
    # Bias add + ReLU in f32 on the VPU.
    h = jnp.maximum(h + b1_ref[...], 0.0)
    # fc2: (tb, 128) @ (128, 2) -> (tb, 2); narrow N is fine, compute is free.
    o = jnp.dot(h, w2_ref[...], preferred_element_type=jnp.float32)
    out_ref[...] = (o + b2_ref[...]).astype(out_ref.dtype)


def prepare_params(w1, b1, w2, b2):
    """One-time padding of the hidden dim (100 -> 128) with zeros.

    Zero padding is mathematically exact: padded hidden units have zero weight
    and zero bias, so they contribute nothing through ReLU and fc2.
    The output dim (2) is NOT padded.
    """
    D, H = w1.shape
    out_dim = w2.shape[1]
    H_pad = _round_up(H, _LANE)

    w1_p = jnp.zeros((D, H_pad), jnp.float32).at[:, :H].set(w1.astype(jnp.float32))
    b1_p = jnp.zeros((1, H_pad), jnp.float32).at[:, :H].set(b1.astype(jnp.float32))
    w2_p = jnp.zeros((H_pad, out_dim), jnp.float32).at[:H, :].set(w2.astype(jnp.float32))
    b2_p = b2.astype(jnp.float32).reshape(1, out_dim)
    return w1_p, b1_p, w2_p, b2_p


def _pick_batch_tile(B, tile_b):
    """Sublane-aligned batch tile.

    Small batches: one tile (per-grid-step overhead dominates, splitting hurts).
    Large batches: at least 2 grid steps so the 'parallel' batch axis can land
    work on both of v7x's TensorCores (harmless on v5e/v6e).
    """
    tile_b = max(_SUBLANE, _round_up(tile_b, _SUBLANE))
    if B < 256:
        return min(_round_up(B, _SUBLANE), tile_b)
    return min(tile_b, _round_up(pl.cdiv(B, 2), _SUBLANE))


def spam_classifier_forward(x, w1_p, b1_p, w2_p, b2_p, *, tile_b=2048):
    """x: (B, D) f32; padded params from prepare_params() -> (B, 2) f32."""
    B, D = x.shape
    H_pad = w1_p.shape[1]
    out_dim = w2_p.shape[1]

    tb = _pick_batch_tile(B, tile_b)
    grid = (pl.cdiv(B, tb),)

    flops = 2 * B * (D * H_pad + H_pad * out_dim)
    bytes_accessed = (x.size * 4 + w1_p.size * 4 + b1_p.size * 4
                      + w2_p.size * 4 + b2_p.size * 4 + B * out_dim * 4)

    return pl.pallas_call(
        _mlp_kernel,
        out_shape=jax.ShapeDtypeStruct((B, out_dim), jnp.float32),
        grid=grid,
        in_specs=[
            # x tile streams over the batch; weights/biases stay resident
            # (constant index_map -> fetched once, kept in VMEM).
            pl.BlockSpec((tb, D), lambda i: (i, 0)),
            pl.BlockSpec((D, H_pad), lambda i: (0, 0)),
            pl.BlockSpec((1, H_pad), lambda i: (0, 0)),
            pl.BlockSpec((H_pad, out_dim), lambda i: (0, 0)),
            pl.BlockSpec((1, out_dim), lambda i: (0, 0)),
        ],
        # Narrow (tb, 2) output block: last dim equals the full array dim.
        out_specs=pl.BlockSpec((tb, out_dim), lambda i: (i, 0)),
        compiler_params=pltpu.CompilerParams(
            # Rows are independent -> shard grid steps across v7x's 2 TCs;
            # harmless no-op on v5e/v6e.
            dimension_semantics=("parallel",),
        ),
        cost_estimate=pl.CostEstimate(
            flops=flops, transcendentals=0, bytes_accessed=bytes_accessed),
    )(x, w1_p, b1_p, w2_p, b2_p)


def init_params(key, input_dim, hidden_dim=100):
    """Deterministic init mimicking PyTorch nn.Linear default (uniform +/- 1/sqrt(fan_in))."""
    k1, k2, k3, k4 = jax.random.split(key, 4)
    bound1 = 1.0 / math.sqrt(input_dim)
    bound2 = 1.0 / math.sqrt(hidden_dim)
    # stored as (in, out) -> transpose of torch's (out, in)
    w1 = jax.random.uniform(k1, (input_dim, hidden_dim), jnp.float32, -bound1, bound1)
    b1 = jax.random.uniform(k2, (hidden_dim,), jnp.float32, -bound1, bound1)
    w2 = jax.random.uniform(k3, (hidden_dim, 2), jnp.float32, -bound2, bound2)
    b2 = jax.random.uniform(k4, (2,), jnp.float32, -bound2, bound2)
    return w1, b1, w2, b2


if __name__ == "__main__":
    key = jax.random.PRNGKey(0)
    kx, kp = jax.random.split(key)

    batch = 8
    input_dim = 32   # bag-of-words / feature vector length
    hidden_dim = 100

    x = jax.random.normal(kx, (batch, input_dim), jnp.float32)
    w1, b1, w2, b2 = init_params(kp, input_dim, hidden_dim)

    # One-time weight/bias padding (hoisted out of the forward pass).
    w1_p, b1_p, w2_p, b2_p = prepare_params(w1, b1, w2, b2)

    out = spam_classifier_forward(x, w1_p, b1_p, w2_p, b2_p)
    out = jax.block_until_ready(out)
    assert out.shape == (batch, 2)

    # Reference: full-f32 math (highest-precision dots). The kernel's f32 MXU
    # matmuls should track this closely; keep a modest tolerance for the
    # MXU's multi-pass f32 arithmetic.
    ref = (jnp.maximum(
        jnp.dot(x, w1, precision=jax.lax.Precision.HIGHEST) + b1, 0.0))
    ref = jnp.dot(ref, w2, precision=jax.lax.Precision.HIGHEST) + b2
    assert jnp.allclose(out, ref, atol=2e-2, rtol=2e-2)

    print("KERNEL_OK")
</pallas_src>

<mosaic_0001>
module attributes {stable_mosaic.version = 11 : i64} {
  func.func @_mlp_kernel(%arg0: i32, %arg1: memref<8x32xf32, #tpu.memory_space<vmem>>, %arg2: memref<32x128xf32, #tpu.memory_space<vmem>>, %arg3: memref<1x128xf32, #tpu.memory_space<vmem>>, %arg4: memref<128x2xf32, #tpu.memory_space<vmem>>, %arg5: memref<1x2xf32, #tpu.memory_space<vmem>>, %arg6: memref<8x2xf32, #tpu.memory_space<vmem>>) attributes {dimension_semantics = [#tpu.dimension_semantics<parallel>], iteration_bounds = array<i64: 1>, scalar_prefetch = 0 : i64, scratch_operands = 0 : i64, tpu.core_type = #tpu.core_type<tc>, window_params = [{transform_indices = @transform_0, window_bounds = array<i64: 8, 32>}, {pipeline_mode = #tpu.pipeline_mode<synchronous>, transform_indices = @transform_1, window_bounds = array<i64: 32, 128>}, {pipeline_mode = #tpu.pipeline_mode<synchronous>, transform_indices = @transform_2, window_bounds = array<i64: 1, 128>}, {pipeline_mode = #tpu.pipeline_mode<synchronous>, transform_indices = @transform_3, window_bounds = array<i64: 128, 2>}, {pipeline_mode = #tpu.pipeline_mode<synchronous>, transform_indices = @transform_4, window_bounds = array<i64: 1, 2>}, {transform_indices = @transform_5, window_bounds = array<i64: 8, 2>}]} {
    %c0 = arith.constant 0 : index
    %c0_0 = arith.constant 0 : index
    %0 = vector.load %arg1[%c0, %c0_0] : memref<8x32xf32, #tpu.memory_space<vmem>>, vector<8x32xf32>
    %c0_1 = arith.constant 0 : index
    %c0_2 = arith.constant 0 : index
    %1 = vector.load %arg2[%c0_1, %c0_2] : memref<32x128xf32, #tpu.memory_space<vmem>>, vector<32x128xf32>
    %cst = arith.constant dense<0.000000e+00> : vector<8x128xf32>
    %2 = tpu.matmul %0, %1, %cst {dimension_numbers = #tpu.dot_dimension_numbers<[1], [0], [0], [1], [0, 0, 1, 1], [], []>} : vector<8x32xf32>, vector<32x128xf32>, vector<8x128xf32> -> vector<8x128xf32>
    %c0_3 = arith.constant 0 : index
    %c0_4 = arith.constant 0 : index
    %3 = vector.load %arg3[%c0_3, %c0_4] : memref<1x128xf32, #tpu.memory_space<vmem>>, vector<1x128xf32>
    %4 = vector.broadcast %3 : vector<1x128xf32> to vector<8x128xf32>
    %5 = arith.addf %2, %4 : vector<8x128xf32>
    %cst_5 = arith.constant 0.000000e+00 : f32
    %6 = vector.broadcast %cst_5 : f32 to vector<8x128xf32>
    %7 = arith.maximumf %5, %6 : vector<8x128xf32>
    %c0_6 = arith.constant 0 : index
    %c0_7 = arith.constant 0 : index
    %8 = vector.load %arg4[%c0_6, %c0_7] : memref<128x2xf32, #tpu.memory_space<vmem>>, vector<128x2xf32>
    %cst_8 = arith.constant dense<0.000000e+00> : vector<8x2xf32>
    %9 = tpu.matmul %7, %8, %cst_8 {dimension_numbers = #tpu.dot_dimension_numbers<[1], [0], [0], [1], [0, 0, 1, 1], [], []>} : vector<8x128xf32>, vector<128x2xf32>, vector<8x2xf32> -> vector<8x2xf32>
    %c0_9 = arith.constant 0 : index
    %c0_10 = arith.constant 0 : index
    %10 = vector.load %arg5[%c0_9, %c0_10] : memref<1x2xf32, #tpu.memory_space<vmem>>, vector<1x2xf32>
    %11 = vector.broadcast %10 : vector<1x2xf32> to vector<8x2xf32>
    %12 = arith.addf %9, %11 : vector<8x2xf32>
    %c0_11 = arith.constant 0 : index
    %c0_12 = arith.constant 0 : index
    %13 = vector.load %arg6[%c0_11, %c0_12] : memref<8x2xf32, #tpu.memory_space<vmem>>, vector<8x2xf32>
    tpu.vector_store %arg6[%c0_11, %c0_12], %12 {strides = array<i32>} : memref<8x2xf32, #tpu.memory_space<vmem>>, vector<8x2xf32>,
    return
  }
  func.func @transform_0(%arg0: i32) -> (i32, i32) {
    %c0_i32 = arith.constant 0 : i32
    %c0_i32_0 = arith.constant 0 : i32
    return %arg0, %c0_i32 : i32, i32
  }
  func.func @transform_1(%arg0: i32) -> (i32, i32) {
    %c0_i32 = arith.constant 0 : i32
    %c0_i32_0 = arith.constant 0 : i32
    %c0_i32_1 = arith.constant 0 : i32
    return %c0_i32, %c0_i32_0 : i32, i32
  }
  func.func @transform_2(%arg0: i32) -> (i32, i32) {
    %c0_i32 = arith.constant 0 : i32
    %c0_i32_0 = arith.constant 0 : i32
    %c0_i32_1 = arith.constant 0 : i32
    return %c0_i32, %c0_i32_0 : i32, i32
  }
  func.func @transform_3(%arg0: i32) -> (i32, i32) {
    %c0_i32 = arith.constant 0 : i32
    %c0_i32_0 = arith.constant 0 : i32
    %c0_i32_1 = arith.constant 0 : i32
    return %c0_i32, %c0_i32_0 : i32, i32
  }
  func.func @transform_4(%arg0: i32) -> (i32, i32) {
    %c0_i32 = arith.constant 0 : i32
    %c0_i32_0 = arith.constant 0 : i32
    %c0_i32_1 = arith.constant 0 : i32
    return %c0_i32, %c0_i32_0 : i32, i32
  }
  func.func @transform_5(%arg0: i32) -> (i32, i32) {
    %c0_i32 = arith.constant 0 : i32
    %c0_i32_0 = arith.constant 0 : i32
    return %arg0, %c0_i32 : i32, i32
  }
}

</mosaic_0001>

<bundles_post_ra>
// kernel: tpu_custom_call.1
= control target key start
LH: loop header
LB: loop body
LE: loop exit
PB: predicated region body
PF: predicated region fallthrough
CT: control target
= control target key end

     0   :  { %v310_v0 = vmov 0.0|0.0   ;;  %vm311_vm0 = vmmov 0   ;;  %v312_v4 = vmov 0.0   ;;  %vm32_vm1 = vcmask 261120   ;;  %s415_s1 = inlined_call_operand.vmem [shape: f32[32,128], index: 1, kind: input, shape index: {}]   ;;  %s416_s3 = inlined_call_operand.vmem [shape: f32[128,2], index: 3, kind: input, shape index: {}]   ;;  %s417_s0 = inlined_call_operand.vmem [shape: f32[8,32], index: 0, kind: input, shape index: {}]   ;;  %s418_s2 = inlined_call_operand.vmem [shape: f32[1,128], index: 2, kind: input, shape index: {}]   ;;  %s419_s4 = inlined_call_operand.vmem [shape: f32[1,2], index: 4, kind: input, shape index: {}]   ;;  %s420_s5 = inlined_call_operand.vmem [shape: f32[8,2], index: 5, kind: output, shape index: {}]  }
   0x1   :  { %277 = vmatprep.subr.bf16.mxu0 %v310_v0  ;;  %v21_v1 = vld [vmem:[%s415_s1] sm:$0xff]  ;;  %v22_v2 = vld [vmem:[%s415_s1 + $0x8] sm:$0xff]  ;;  %v23_v3 = vld [vmem:[%s415_s1 + $0x10] sm:$0xff]  ;;  %239 = vmatprep.mubr.msk.f32.mxu0 %vm311_vm0, %v312_v4  ;;  %vm200_vm2 = vcmask 15360  }
   0x2   :  { %v278_v5 = vpack.c.bf16 %v22_v2, %v21_v1  ;;  %v24_v6 = vld [vmem:[%s415_s1 + $0x18] sm:$0xff]  ;;  %283 = vmatprep.subr.bf16.mxu1 %v310_v0  ;;  %v107_v7 = vld [vmem:[%s416_s3] sm:$0xff]  ;;  %274 = vmatprep.mubr.msk.f32.mxu1 %vm311_vm0, %v312_v4  ;;  %v108_v8 = vld [vmem:[%s416_s3 + $0x8] sm:$0xff] }
   0x3   :  { %v109_v9 = vld [vmem:[%s416_s3 + $0x10] sm:$0xff]  ;;  %v110_v10 = vld [vmem:[%s416_s3 + $0x18] sm:$0xff]  ;;  %v281_v11 = vpack.c.bf16 %v24_v6, %v23_v3  ;;  %v284_v12 = vpack.c.bf16 %v108_v8, %v107_v7  ;;  %v111_v14 = vld [vmem:[%s416_s3 + $0x20] sm:$0xff] }
   0x4   :  { %279 = vmatpush3.bf16.msra.mxu0 %v278_v5  ;;  %v287_v13 = vpack.c.bf16 %v110_v10, %v109_v9  ;;  %v112_v15 = vld [vmem:[%s416_s3 + $0x28] sm:$0xff]  ;;  %v20_v16 = vld [vmem:[%s417_s0] sm:$0xff]  ;;  %v113_v18 = vld [vmem:[%s416_s3 + $0x30] sm:$0xff] }
   0x5   :  { %280 = vmatprep.subr.bf16.mxu0 %v310_v0  ;;  %285 = vmatpush3.bf16.msra.mxu1 %v284_v12  ;;  %v290_v17 = vpack.c.bf16 %v112_v15, %v111_v14  ;;  %v114_v19 = vld [vmem:[%s416_s3 + $0x38] sm:$0xff]  ;;  %v115_v21 = vld [vmem:[%s416_s3 + $0x40] sm:$0xff]  ;;  %v116_v22 = vld [vmem:[%s416_s3 + $0x48] sm:$0xff] }
   0x6   :  { %286 = vmatprep.subr.bf16.mxu1 %v310_v0  ;;  %v293_v20 = vpack.c.bf16 %v114_v19, %v113_v18  ;;  %v296_v23 = vpack.c.bf16 %v116_v22, %v115_v21  ;;  %v117_v24 = vld [vmem:[%s416_s3 + $0x50] sm:$0xff]  ;;  %v118_v25 = vld [vmem:[%s416_s3 + $0x58] sm:$0xff]  ;;  %v119_v27 = vld [vmem:[%s416_s3 + $0x60] sm:$0xff] }
   0x7   :  { %v299_v26 = vpack.c.bf16 %v118_v25, %v117_v24  ;;  %v120_v28 = vld [vmem:[%s416_s3 + $0x68] sm:$0xff]  ;;  %v121_v30 = vld [vmem:[%s416_s3 + $0x70] sm:$0xff]  ;;  %v122_v31 = vld [vmem:[%s416_s3 + $0x78] sm:$0xff] }
   0x8   :  { %282 = vmatpush3.bf16.msra.mxu0 %v281_v11  ;;  %v302_v29 = vpack.c.bf16 %v120_v28, %v119_v27  ;;  %v305_v32 = vpack.c.bf16 %v122_v31, %v121_v30  ;;  %v206_v33 = vld [vmem:[%s418_s2] ss:$0 sm:$0xff] }
   0x9   :  { %288 = vmatpush3.bf16.msra.mxu1 %v287_v13  ;;  %v208_v38 = vld [vmem:[%s419_s4] ss:$0 sm:$0xff] }
   0xa   :  { %289 = vmatprep.subr.bf16.mxu1 %v310_v0 }
   0xb   :  { %240 = vmatmul.mubr.msk.f32.vlgmr.msra.gmra.mrb[0].mxu0 %vm32_vm1, %v20_v16 }
   0xd   :  { %291 = vmatpush3.bf16.msra.mxu1 %v290_v17 }
   0xe   :  { %292 = vmatprep.subr.bf16.mxu1 %v310_v0 }
  0x11   :  { %294 = vmatpush3.bf16.msra.mxu1 %v293_v20 }
  0x12   :  { %295 = vmatprep.subr.bf16.mxu1 %v310_v0 }
  0x15   :  { %297 = vmatpush3.bf16.msra.mxu1 %v296_v23 }
  0x16   :  { %298 = vmatprep.subr.bf16.mxu1 %v310_v0 }
  0x19   :  { %300 = vmatpush3.bf16.msra.mxu1 %v299_v26 }
  0x1a   :  { %301 = vmatprep.subr.bf16.mxu1 %v310_v0 }
  0x1d   :  { %303 = vmatpush3.bf16.msra.mxu1 %v302_v29 }
  0x1e   :  { %304 = vmatprep.subr.bf16.mxu1 %v310_v0 }
  0x21   :  { %306 = vmatpush3.bf16.msra.mxu1 %v305_v32 }
  0xde   :  { %v102_v34 = vpop.f32.mrb[0].mxu0 }
  0xdf   :  { %v103_v35 = vadd.f32 %v206_v33, %v102_v34  ;;  %v241_v36 = vpop.f32.mrb[1].mxu0 }
  0xe1   :  { %v106_v37 = vmax.f32 %v103_v35, 0.0 }
  0xe3   :  { %275 = vmatmul.mubr.f32.vlgmr.msra.gmra.mrb[0].mxu1 %v106_v37 }
 0x1b6   :  { %v196_v39 = vpop.f32.mrb[0].mxu1 }
 0x1b7   :  { %v197_v40 = vadd.f32 %v208_v38, %v196_v39  ;;  %v276_v41 = vpop.f32.mrb[1].mxu1 }
 0x1b9   :  { %201 = vst.msk [vmem:[%s420_s5] sm:$0xff] %vm200_vm2, %v197_v40 }

</bundles_post_ra>
